<compile_context>
chip_gen: v7x
topology: tpu7x:2x2x1
jax: 0.10.0
libtpu: 0.0.40
codegen_flags: <defaults>
</compile_context>

<pallas_src>
import jax
import jax.numpy as jnp
from jax.experimental import pallas as pl
from jax.experimental.pallas import tpu as pltpu


def _tpool_kernel(x_ref, o_ref):
    # x_ref: (n_segment, r_chunk, L)  -- full temporal axis for one feature slab.
    # o_ref: (n_out,     r_chunk, L)
    n_seg = x_ref.shape[0]
    n_out = o_ref.shape[0]
    # n_out is small; unrolled at trace time with static indices only.
    for t in range(n_out):
        li = max(2 * t - 1, 0)            # clamp == -inf pad for a max-pool
        ci = 2 * t
        ri = min(2 * t + 1, n_seg - 1)
        l = x_ref[li]                     # (r_chunk, L) dense tile
        c = x_ref[ci]
        r = x_ref[ri]
        o_ref[t] = jnp.maximum(jnp.maximum(l, c), r)


def _pick_r_chunk(R, n_segment, L, itemsize, target_bytes=2 << 20):
    """Largest multiple-of-8 divisor of R whose input block stays near target_bytes."""
    max_rc = max(8, target_bytes // (n_segment * L * itemsize))
    if R <= max_rc:
        return R                           # full extent: always legal as a block dim
    best = R                               # fallback: full extent (bigger block, still legal)
    for rc in range(8, min(R, max_rc) + 1, 8):
        if R % rc == 0:
            best = rc
    return best


def temporal_pool_pallas(x, n_segment):
    """x: (nt, C, H, W) float array. Returns (nt // 2, C, H, W)."""
    nt, c, h, w = x.shape
    assert nt % n_segment == 0, "nt must be a multiple of n_segment"
    assert n_segment % 2 == 0, "this wrapper assumes an even n_segment (matches nt//2 view)"
    n_batch = nt // n_segment
    n_out = n_segment // 2  # == floor((n_segment + 2 - 3)/2) + 1 for even n_segment

    feat = c * h * w
    itemsize = jnp.dtype(x.dtype).itemsize

    # Lane/sublane-dense factorization of the per-frame features: last dim a
    # multiple of 128, second-to-last chunked in multiples of 8 where possible.
    if feat % 128 == 0:
        lanes = 128
        rows = feat // 128
    else:
        # Fallback: keep (C, H*W) as the feature tile (less dense but correct).
        lanes = h * w
        rows = c

    r_chunk = _pick_r_chunk(rows, n_segment, lanes, itemsize)
    n_r = rows // r_chunk  # r_chunk divides rows by construction

    xr = x.reshape(n_batch, n_segment, rows, lanes)

    in_block = (None, n_segment, r_chunk, lanes)   # None -> batch dim squeezed
    out_block = (None, n_out, r_chunk, lanes)

    block_bytes = (n_segment + n_out) * r_chunk * lanes * itemsize
    # Explicit scoped-VMEM limit: generous but safely under v7x's 64 MiB physical.
    vmem_limit = int(min(64 * 1024 * 1024, max(32 * 1024 * 1024, 4 * block_bytes)))

    out = pl.pallas_call(
        _tpool_kernel,
        out_shape=jax.ShapeDtypeStruct((n_batch, n_out, rows, lanes), x.dtype),
        grid=(n_batch, n_r),
        in_specs=[pl.BlockSpec(in_block, lambda b, r: (b, 0, r, 0))],
        out_specs=pl.BlockSpec(out_block, lambda b, r: (b, 0, r, 0)),
        compiler_params=pltpu.CompilerParams(
            dimension_semantics=("parallel", "parallel"),
            vmem_limit_bytes=vmem_limit,
        ),
    )(xr)

    return out.reshape(nt // 2, c, h, w)


def temporal_pool_module_forward(x, n_segment):
    """Forward of TemporalPool: temporal_pool followed by self.net."""
    pooled = temporal_pool_pallas(x, n_segment)
    # TODO(synk): `self.net` is an arbitrary injected submodule; identity used here.
    return pooled


def _reference_temporal_pool(x, n_segment):
    """Pure-JAX reference mirroring F.max_pool3d((3,1,1),(2,1,1),(1,0,0))."""
    nt, c, h, w = x.shape
    n_batch = nt // n_segment
    xr = x.reshape(n_batch, n_segment, c, h, w)
    neg_inf = jnp.full((n_batch, 1, c, h, w), -jnp.inf, dtype=x.dtype)
    xp = jnp.concatenate([neg_inf, xr, neg_inf], axis=1)  # pad temporal
    n_out = (n_segment - 1) // 2 + 1
    outs = []
    for t in range(n_out):
        window = xp[:, 2 * t : 2 * t + 3]
        outs.append(jnp.max(window, axis=1))
    out = jnp.stack(outs, axis=1)
    return out.reshape(nt // 2, c, h, w)


if __name__ == "__main__":
    key = jax.random.PRNGKey(0)
    n_segment = 8
    n_batch = 2
    c, h, w = 4, 16, 16
    nt = n_batch * n_segment

    x = jax.random.normal(key, (nt, c, h, w), dtype=jnp.float32)

    y = temporal_pool_module_forward(x, n_segment)
    y = jax.block_until_ready(y)

    y_ref = _reference_temporal_pool(x, n_segment)
    assert y.shape == (nt // 2, c, h, w), y.shape
    assert jnp.allclose(y, y_ref), "Pallas temporal pool mismatch vs reference"

    print("KERNEL_OK")
</pallas_src>

<mosaic_0001>
module attributes {stable_mosaic.version = 11 : i64} {
  func.func @_tpool_kernel(%arg0: i32, %arg1: i32, %arg2: memref<1x8x8x128xf32, #tpu.memory_space<vmem>>, %arg3: memref<1x4x8x128xf32, #tpu.memory_space<vmem>>) attributes {dimension_semantics = [#tpu.dimension_semantics<parallel>, #tpu.dimension_semantics<parallel>], iteration_bounds = array<i64: 2, 1>, scalar_prefetch = 0 : i64, scratch_operands = 0 : i64, tpu.core_type = #tpu.core_type<tc>, window_params = [{transform_indices = @transform_0, window_bounds = array<i64: 1, 8, 8, 128>}, {transform_indices = @transform_1, window_bounds = array<i64: 1, 4, 8, 128>}]} {
    %c0 = arith.constant 0 : index
    %c0_0 = arith.constant 0 : index
    %c0_1 = arith.constant 0 : index
    %c0_2 = arith.constant 0 : index
    %0 = vector.load %arg2[%c0, %c0_0, %c0_1, %c0_2] : memref<1x8x8x128xf32, #tpu.memory_space<vmem>>, vector<1x1x8x128xf32>
    %1 = vector.shape_cast %0 : vector<1x1x8x128xf32> to vector<8x128xf32>
    %c0_3 = arith.constant 0 : index
    %c0_4 = arith.constant 0 : index
    %c0_5 = arith.constant 0 : index
    %c0_6 = arith.constant 0 : index
    %2 = vector.load %arg2[%c0_3, %c0_4, %c0_5, %c0_6] : memref<1x8x8x128xf32, #tpu.memory_space<vmem>>, vector<1x1x8x128xf32>
    %3 = vector.shape_cast %2 : vector<1x1x8x128xf32> to vector<8x128xf32>
    %c0_7 = arith.constant 0 : index
    %c1 = arith.constant 1 : index
    %c0_8 = arith.constant 0 : index
    %c0_9 = arith.constant 0 : index
    %4 = vector.load %arg2[%c0_7, %c1, %c0_8, %c0_9] : memref<1x8x8x128xf32, #tpu.memory_space<vmem>>, vector<1x1x8x128xf32>
    %5 = vector.shape_cast %4 : vector<1x1x8x128xf32> to vector<8x128xf32>
    %6 = arith.maximumf %1, %3 : vector<8x128xf32>
    %7 = arith.maximumf %6, %5 : vector<8x128xf32>
    %c0_10 = arith.constant 0 : index
    %c0_11 = arith.constant 0 : index
    %c0_12 = arith.constant 0 : index
    %c0_13 = arith.constant 0 : index
    %8 = vector.load %arg3[%c0_10, %c0_11, %c0_12, %c0_13] : memref<1x4x8x128xf32, #tpu.memory_space<vmem>>, vector<1x1x8x128xf32>
    %9 = vector.shape_cast %8 : vector<1x1x8x128xf32> to vector<8x128xf32>
    %10 = vector.shape_cast %7 : vector<8x128xf32> to vector<1x1x8x128xf32>
    tpu.vector_store %arg3[%c0_10, %c0_11, %c0_12, %c0_13], %10 {strides = array<i32>} : memref<1x4x8x128xf32, #tpu.memory_space<vmem>>, vector<1x1x8x128xf32>,
    %c0_14 = arith.constant 0 : index
    %c1_15 = arith.constant 1 : index
    %c0_16 = arith.constant 0 : index
    %c0_17 = arith.constant 0 : index
    %11 = vector.load %arg2[%c0_14, %c1_15, %c0_16, %c0_17] : memref<1x8x8x128xf32, #tpu.memory_space<vmem>>, vector<1x1x8x128xf32>
    %12 = vector.shape_cast %11 : vector<1x1x8x128xf32> to vector<8x128xf32>
    %c0_18 = arith.constant 0 : index
    %c2 = arith.constant 2 : index
    %c0_19 = arith.constant 0 : index
    %c0_20 = arith.constant 0 : index
    %13 = vector.load %arg2[%c0_18, %c2, %c0_19, %c0_20] : memref<1x8x8x128xf32, #tpu.memory_space<vmem>>, vector<1x1x8x128xf32>
    %14 = vector.shape_cast %13 : vector<1x1x8x128xf32> to vector<8x128xf32>
    %c0_21 = arith.constant 0 : index
    %c3 = arith.constant 3 : index
    %c0_22 = arith.constant 0 : index
    %c0_23 = arith.constant 0 : index
    %15 = vector.load %arg2[%c0_21, %c3, %c0_22, %c0_23] : memref<1x8x8x128xf32, #tpu.memory_space<vmem>>, vector<1x1x8x128xf32>
    %16 = vector.shape_cast %15 : vector<1x1x8x128xf32> to vector<8x128xf32>
    %17 = arith.maximumf %12, %14 : vector<8x128xf32>
    %18 = arith.maximumf %17, %16 : vector<8x128xf32>
    %c0_24 = arith.constant 0 : index
    %c1_25 = arith.constant 1 : index
    %c0_26 = arith.constant 0 : index
    %c0_27 = arith.constant 0 : index
    %19 = vector.load %arg3[%c0_24, %c1_25, %c0_26, %c0_27] : memref<1x4x8x128xf32, #tpu.memory_space<vmem>>, vector<1x1x8x128xf32>
    %20 = vector.shape_cast %19 : vector<1x1x8x128xf32> to vector<8x128xf32>
    %21 = vector.shape_cast %18 : vector<8x128xf32> to vector<1x1x8x128xf32>
    tpu.vector_store %arg3[%c0_24, %c1_25, %c0_26, %c0_27], %21 {strides = array<i32>} : memref<1x4x8x128xf32, #tpu.memory_space<vmem>>, vector<1x1x8x128xf32>,
    %c0_28 = arith.constant 0 : index
    %c3_29 = arith.constant 3 : index
    %c0_30 = arith.constant 0 : index
    %c0_31 = arith.constant 0 : index
    %22 = vector.load %arg2[%c0_28, %c3_29, %c0_30, %c0_31] : memref<1x8x8x128xf32, #tpu.memory_space<vmem>>, vector<1x1x8x128xf32>
    %23 = vector.shape_cast %22 : vector<1x1x8x128xf32> to vector<8x128xf32>
    %c0_32 = arith.constant 0 : index
    %c4 = arith.constant 4 : index
    %c0_33 = arith.constant 0 : index
    %c0_34 = arith.constant 0 : index
    %24 = vector.load %arg2[%c0_32, %c4, %c0_33, %c0_34] : memref<1x8x8x128xf32, #tpu.memory_space<vmem>>, vector<1x1x8x128xf32>
    %25 = vector.shape_cast %24 : vector<1x1x8x128xf32> to vector<8x128xf32>
    %c0_35 = arith.constant 0 : index
    %c5 = arith.constant 5 : index
    %c0_36 = arith.constant 0 : index
    %c0_37 = arith.constant 0 : index
    %26 = vector.load %arg2[%c0_35, %c5, %c0_36, %c0_37] : memref<1x8x8x128xf32, #tpu.memory_space<vmem>>, vector<1x1x8x128xf32>
    %27 = vector.shape_cast %26 : vector<1x1x8x128xf32> to vector<8x128xf32>
    %28 = arith.maximumf %23, %25 : vector<8x128xf32>
    %29 = arith.maximumf %28, %27 : vector<8x128xf32>
    %c0_38 = arith.constant 0 : index
    %c2_39 = arith.constant 2 : index
    %c0_40 = arith.constant 0 : index
    %c0_41 = arith.constant 0 : index
    %30 = vector.load %arg3[%c0_38, %c2_39, %c0_40, %c0_41] : memref<1x4x8x128xf32, #tpu.memory_space<vmem>>, vector<1x1x8x128xf32>
    %31 = vector.shape_cast %30 : vector<1x1x8x128xf32> to vector<8x128xf32>
    %32 = vector.shape_cast %29 : vector<8x128xf32> to vector<1x1x8x128xf32>
    tpu.vector_store %arg3[%c0_38, %c2_39, %c0_40, %c0_41], %32 {strides = array<i32>} : memref<1x4x8x128xf32, #tpu.memory_space<vmem>>, vector<1x1x8x128xf32>,
    %c0_42 = arith.constant 0 : index
    %c5_43 = arith.constant 5 : index
    %c0_44 = arith.constant 0 : index
    %c0_45 = arith.constant 0 : index
    %33 = vector.load %arg2[%c0_42, %c5_43, %c0_44, %c0_45] : memref<1x8x8x128xf32, #tpu.memory_space<vmem>>, vector<1x1x8x128xf32>
    %34 = vector.shape_cast %33 : vector<1x1x8x128xf32> to vector<8x128xf32>
    %c0_46 = arith.constant 0 : index
    %c6 = arith.constant 6 : index
    %c0_47 = arith.constant 0 : index
    %c0_48 = arith.constant 0 : index
    %35 = vector.load %arg2[%c0_46, %c6, %c0_47, %c0_48] : memref<1x8x8x128xf32, #tpu.memory_space<vmem>>, vector<1x1x8x128xf32>
    %36 = vector.shape_cast %35 : vector<1x1x8x128xf32> to vector<8x128xf32>
    %c0_49 = arith.constant 0 : index
    %c7 = arith.constant 7 : index
    %c0_50 = arith.constant 0 : index
    %c0_51 = arith.constant 0 : index
    %37 = vector.load %arg2[%c0_49, %c7, %c0_50, %c0_51] : memref<1x8x8x128xf32, #tpu.memory_space<vmem>>, vector<1x1x8x128xf32>
    %38 = vector.shape_cast %37 : vector<1x1x8x128xf32> to vector<8x128xf32>
    %39 = arith.maximumf %34, %36 : vector<8x128xf32>
    %40 = arith.maximumf %39, %38 : vector<8x128xf32>
    %c0_52 = arith.constant 0 : index
    %c3_53 = arith.constant 3 : index
    %c0_54 = arith.constant 0 : index
    %c0_55 = arith.constant 0 : index
    %41 = vector.load %arg3[%c0_52, %c3_53, %c0_54, %c0_55] : memref<1x4x8x128xf32, #tpu.memory_space<vmem>>, vector<1x1x8x128xf32>
    %42 = vector.shape_cast %41 : vector<1x1x8x128xf32> to vector<8x128xf32>
    %43 = vector.shape_cast %40 : vector<8x128xf32> to vector<1x1x8x128xf32>
    tpu.vector_store %arg3[%c0_52, %c3_53, %c0_54, %c0_55], %43 {strides = array<i32>} : memref<1x4x8x128xf32, #tpu.memory_space<vmem>>, vector<1x1x8x128xf32>,
    return
  }
  func.func @transform_0(%arg0: i32, %arg1: i32) -> (i32, i32, i32, i32) {
    %c0_i32 = arith.constant 0 : i32
    %c0_i32_0 = arith.constant 0 : i32
    %c0_i32_1 = arith.constant 0 : i32
    return %arg0, %c0_i32, %arg1, %c0_i32_0 : i32, i32, i32, i32
  }
  func.func @transform_1(%arg0: i32, %arg1: i32) -> (i32, i32, i32, i32) {
    %c0_i32 = arith.constant 0 : i32
    %c0_i32_0 = arith.constant 0 : i32
    %c0_i32_1 = arith.constant 0 : i32
    return %arg0, %c0_i32, %arg1, %c0_i32_0 : i32, i32, i32, i32
  }
}

</mosaic_0001>

<bundles_post_ra>
// kernel: tpu_custom_call.1
= control target key start
LH: loop header
LB: loop body
LE: loop exit
PB: predicated region body
PF: predicated region fallthrough
CT: control target
= control target key end

     0   :  { %6 = vsyncpa [#allocation3], 0  ;;  %s686_s0 = inlined_call_operand.hbm [shape: f32[2,8,8,128], index: 0, kind: input, shape index: {}]   ;;  %s687_s1 = inlined_call_operand.hbm [shape: f32[2,4,8,128], index: 1, kind: output, shape index: {}]  }
   0x1   :  { %8 = vsyncpa [#allocation3 + $0x1], 0 }
   0x2   :  { %9 = vsyncpa [#allocation4], 0 }
   0x3   :  { %11 = vsyncpa [#allocation4 + $0x1], 0  ;;  %s510_s6 = smov 0   ;;  %s512_s7 = smov 0  }
   0x4   :  { %s514_s8 = smov 0   ;;  %s516_s9 = smov 0  }
   0x5   :  { %s518_s10 = smov 0   ;;  %s520_s11 = smov 0  }
   0x6 LB: > { %s284_s12 = sadd.s32 4294967295, %s492_s11   ;;  %s285_s13 = sadd.s32 4294967294, %s492_s11   ;;  %s492_s11 = sphi %s520_s11, %s17_s11   ;;  %s488_s10 = sphi %s518_s10, %s702_s10   ;;  %s484_s9 = sphi %s516_s9, %s701_s9   ;;  %s480_s8 = sphi %s514_s8, %s700_s8   ;;  %s476_s7 = sphi %s512_s7, %s699_s7   ;;  %s472_s6 = sphi %s510_s6, %s698_s6  }
   0x7   : > { %s29_s14 = sadd.s32 1, %s488_s10  ;;  %s38_s15 = sadd.s32 1, %s480_s8 }
   0x8   : > { %p31_p0 = scmp.ge.s32.totalorder %s29_s14, 2  ;;  %p45_p1 = scmp.ne.s32.totalorder %s480_s8, %s476_s7 }
   0x9   : > { %p46_p2 = scmp.eq.s32.totalorder %s492_s11, 0  ;;  %p51_p3 = scmp.ne.s32.totalorder %s476_s7, %s472_s6 }
   0xa   : > { %s704_s14 = smov (%p31_p0, %s29_s14), 0  ;;  %p52_p5 = scmp.eq.s32.totalorder %s284_s12, 0 }
   0xb   : > { %p551_p4 = por %p46_p2, %p45_p1  ;;  %s33_s17 = ssub.s32 %s488_s10, %s704_s14 }
   0xc   : > { %p77_p6 = scmp.eq.s32.totalorder %s284_s12, 1  ;;  %p36_p7 = scmp.eq.s32.totalorder %s33_s17, 0 }
   0xd   : > { %p557_p8 = por %p52_p5, %p51_p3  ;;  %p83_p10 = scmp.eq.s32.totalorder %s285_s13, 1 }
   0xe   : > { %p561_p9 = por %p77_p6, %p45_p1  ;;  %p326_p13 = scmp.lt.s32.totalorder %s492_s11, 2 }
   0xf   : > { %s566_s20 = scalar_select %p36_p7, %s480_s8, %s38_s15  }
  0x10   : > { %s691_s19 = scalar_select %p561_p9, 1, 0 }
  0x11   : > { %p568_p11 = por %p83_p10, %p51_p3  ;;  %s103_s22 = sand.u32 1, %s480_s8  }
  0x12   : > { %s288_s23 = sshll.u32 %s103_s22, 6  ;;  %s312_s24 = sshll.u32 %s488_s10, 10 }
  0x13   : > { %s692_s21 = scalar_select %p568_p11, 1, 0 }
  0x14   : > { %s579_s27 = scalar_lea.hbm %s686_s0, %s312_s24  ;;  %s107_s28 = scalar_lea.vmem [#allocation2], %s288_s23 }
  0x15   : > { %s115_s29 = sshll.u32 %s107_s28, 4  ;;  %p585_p0 = pnand %p326_p13, %p551_p4  ;;  %s581_s29 = int_to_ptr.vmem [resolvable:$true] %s115_s29 }
  0x16   : > { %s590_s2 = scalar_lea.sflag [#allocation3], %s103_s22  ;;  %s380_s3 = scalar_lea.hbm %s579_s27, 1024 }
  0x17   : > { %p381_p2 = scmp.ne.s32.totalorder %s579_s27, %s380_s3  ;;  %p382_p3 = pneg %p585_p0 }
  0x18   : > { %s385_s12 = scalar_lea.hbm %s686_s0, 2048  ;;  %p386_p4 = scmp.lt.u32.totalorder %s579_s27, %s686_s0 }
  0x19   : > { %p383_p5 = pnand %p382_p3, %p381_p2  ;;  %p387_p7 = scmp.lt.u32.totalorder %s385_s12, %s380_s3 }
  0x1a   : > { %p389_p13 = scmp.lt.u32.totalorder %s380_s3, %s579_s27 }
  0x1b   : > { %p384_p6 = pneg %p383_p5  ;;  %p388_p10 = por %p387_p7, %p386_p4 }
  0x1d   : > { %p390_p12 = por %p389_p13, %p388_p10 }
  0x1f   : > { %p391_p1 = pnand %p390_p12, %p384_p6 }
  0x21   : > { %394 = shalt.err (!%p391_p1)
}
  0x22   : > { %s395_s16 = scalar_lea.vmem %s581_s29, 1024  ;;  %s494_s17 = smov [#allocation2]  }
  0x23   : > { %p396_p2 = scmp.ne.s32.totalorder %s581_s29, %s395_s16  ;;  %s400_s22 = sshll.u32 %s494_s17, 4  ;;  %s401_s22 = int_to_ptr.vmem [resolvable:$false] %s400_s22 }
  0x24   : > { %s402_s23 = scalar_lea.vmem %s401_s22, 2048  ;;  %p403_p9 = scmp.lt.s32.totalorder %s581_s29, %s401_s22 }
  0x25   : > { %p398_p5 = pnand %p396_p2, %p382_p3  ;;  %p404_p4 = scmp.lt.s32.totalorder %s402_s23, %s395_s16 }
  0x27   : > { %p399_p11 = pneg %p398_p5  ;;  %p405_p7 = por %p404_p4, %p403_p9 }
  0x29   : > { %p406_p10 = pnand %p405_p7, %p399_p11 }
  0x2b   : > { %409 = shalt.err (!%p406_p10)
}
  0x2c   : > { %s495_s24 = smov 128   ;;  %s496_s25 = smov 8  }
  0x2d   : > { %321 = dma.hbm_to_vmem [thread:$0]  (!%p585_p0), %s579_s27, 1024, %s581_s29, %s590_s2, %s495_s24, %s495_s24, %s496_s25  }
  0x2e   : > { %p123_p12 = scmp.lt.s32.totalorder %s492_s11, 3  ;;  %p694_p1 = scmp.ge.s32.totalorder %s492_s11, 1 }
  0x30   : > { %p124_p3 = pnand %p694_p1, %p123_p12 }
  0x31   : > { %s622_s26 = sand.u32 (!%p124_p3), 1, %s476_s7  }
  0x32   : > { %127 = sbr.rel (%p124_p3) target bundleno = 85 (0x55), region = 24  ;;  %s292_s28 = sshll.u32 (!%p124_p3), %s622_s26, 6 }
  0x33   : > { %s130_s3 = scalar_lea.sflag (!%p124_p3), [#allocation3], %s622_s26  ;;  %s133_s4 = scalar_lea.vmem (!%p124_p3), [#allocation2], %s292_s28 }
  0x39   : > { %463 = dma.done.wait (%p557_p8), %s130_s3, 1024  }
  0x3a   : > { %465 = vsyncadd (%p557_p8), %s130_s3, 4294966272  ;;  %s293_s27 = sshll.u32 %s622_s26, 5  ;;  %v152_v0 = vld [vmem:[%s133_s4] sm:$0xff]  ;;  %v294_v1 = vld [vmem:[%s133_s4 + $0x8] sm:$0xff]  ;;  %s313_s2 = sshll.u32 %s484_s9, 9 }
  0x3b   : > { %v296_v2 = vld [vmem:[%s133_s4 + $0x10] sm:$0xff]  ;;  %v155_v3 = vmax.f32 %v152_v0, %v294_v1  ;;  %s151_s29 = scalar_lea.vmem [#allocation5], %s293_s27  ;;  %v297_v4 = vld [vmem:[%s133_s4 + $0x18] sm:$0xff]  ;;  %v300_v6 = vld [vmem:[%s133_s4 + $0x20] sm:$0xff]  ;;  %s637_s12 = scalar_lea.hbm %s687_s1, %s313_s2 }
  0x3c   : > { %s199_s30 = sshll.u32 %s151_s29, 4  ;;  %v162_v5 = vmax.f32 %v294_v1, %v296_v2  ;;  %v301_v7 = vld [vmem:[%s133_s4 + $0x28] sm:$0xff]  ;;  %v171_v8 = vmax.f32 %v297_v4, %v300_v6  ;;  %v304_v9 = vld [vmem:[%s133_s4 + $0x30] sm:$0xff]  ;;  %v305_v10 = vld [vmem:[%s133_s4 + $0x38] sm:$0xff]  ;;  %s185_s9 = scalar_lea.sflag [#allocation4], %s622_s26  ;;  %s632_s30 = int_to_ptr.vmem [resolvable:$true] %s199_s30 }
  0x3d   : > { %156 = vst [vmem:[%s151_s29] sm:$0xff] %v155_v3  ;;  %v180_v12 = vmax.f32 %v301_v7, %v304_v9  ;;  %s410_s13 = scalar_lea.vmem %s632_s30, 512  ;;  %p695_p9 = scmp.ne.s32.totalorder %s691_s19, 0 }
  0x3e   : > { %v163_v11 = vmax.f32 %v162_v5, %v297_v4  ;;  %v172_v13 = vmax.f32 %v171_v8, %v301_v7  ;;  %p411_p8 = scmp.ne.s32.totalorder %s632_s30, %s410_s13  ;;  %s497_s15 = smov [#allocation5]  }
  0x3f   : > { %v181_v14 = vmax.f32 %v180_v12, %v305_v10  ;;  %s414_s16 = sshll.u32 %s497_s15, 4  ;;  %s415_s16 = int_to_ptr.vmem [resolvable:$false] %s414_s16 }
  0x40   : > { %298 = vst [vmem:[%s151_s29 + $0x8] sm:$0xff] %v163_v11  ;;  %302 = vst [vmem:[%s151_s29 + $0x10] sm:$0xff] %v172_v13  ;;  %p412_p11 = pnand %p411_p8, %p695_p9  ;;  %s416_s17 = scalar_lea.vmem %s415_s16, 1024 }
  0x41   : > { %306 = vst [vmem:[%s151_s29 + $0x18] sm:$0xff] %v181_v14  ;;  %p417_p6 = scmp.lt.s32.totalorder %s632_s30, %s415_s16  ;;  %p418_p13 = scmp.lt.s32.totalorder %s416_s17, %s410_s13 }
  0x42   : > { %p413_p0 = pneg %p412_p11 }
  0x43   : > { %p419_p2 = por %p418_p13, %p417_p6 }
  0x45   : > { %p420_p5 = pnand %p419_p2, %p413_p0 }
  0x47   : > { %423 = shalt.err (!%p420_p5)
}
  0x48   : > { %s424_s22 = scalar_lea.hbm %s637_s12, 512  ;;  %s428_s25 = scalar_lea.hbm %s687_s1, 1024 }
  0x49   : > { %p425_p4 = scmp.ne.s32.totalorder %s637_s12, %s424_s22  ;;  %p429_p12 = scmp.lt.u32.totalorder %s637_s12, %s687_s1 }
  0x4a   : > { %p430_p1 = scmp.lt.u32.totalorder %s428_s25, %s424_s22  ;;  %p432_p8 = scmp.lt.u32.totalorder %s424_s22, %s637_s12 }
  0x4b   : > { %p426_p7 = pnand %p425_p4, %p695_p9 }
  0x4c   : > { %p431_p3 = por %p430_p1, %p429_p12 }
  0x4d   : > { %p427_p10 = pneg %p426_p7 }
  0x4e   : > { %p433_p11 = por %p432_p8, %p431_p3 }
  0x50   : > { %p434_p0 = pnand %p433_p11, %p427_p10 }
  0x52   : > { %437 = shalt.err (!%p434_p0)
}
  0x53   : > { %s498_s4 = smov 128   ;;  %s499_s27 = smov 8  }
  0x54   : > { %316 = dma.vmem_to_hbm [thread:$0]  (%p695_p9), %s632_s30, 512, %s637_s12, %s185_s9, %s498_s4, %s498_s4, %s499_s27  }
  0x55 PF: > { %s214_s29 = sand.u32 1, %s472_s6   ;;  %p696_p6 = scmp.ne.s32.totalorder %s692_s21, 0 }
  0x56   : > { %p697_p13 = scmp.ge.s32.totalorder %s492_s11, 2  ;;  %s215_s2 = scalar_lea.sflag [#allocation4], %s214_s29 }
  0x58   : > { %p323_p2 = pnand %p697_p13, %p696_p6 }
  0x5a   : > { %467 = dma.done.wait (!%p323_p2), %s215_s2, 512  }
  0x5b   : > { %469 = vsyncadd (!%p323_p2), %s215_s2, 4294966784  ;;  %s17_s11 = sadd.s32 1, %s492_s11   ;;  %s698_s6 = smov %s476_s7 }
  0x5c   : > { %p14_p5 = scmp.ge.s32.totalorder %s17_s11, 4   ;;  %s699_s7 = smov %s480_s8 }
  0x5d   : > { %s700_s8 = smov %s566_s20  ;;  %s701_s9 = smov %s488_s10 }
  0x5e   : > { %s702_s10 = smov %s704_s14  ;;  %16 = sbr.rel (!%p14_p5) target bundleno = 6 (0x6), region = 79 }
  0x65   :  { %220 = vsyncpa [#allocation3], 1 }
  0x66   :  { %222 = vsyncpa [#allocation3 + $0x1], 1 }
  0x67   :  { %223 = vsyncpa [#allocation4], 1 }
  0x68   :  { %225 = vsyncpa [#allocation4 + $0x1], 1 }

</bundles_post_ra>
